<compile_context>
chip_gen: v6e
topology: v6e:2x2x1
jax: 0.10.0
libtpu: 0.0.40
codegen_flags: <defaults>
</compile_context>

<pallas_src>
import math

import jax
import jax.numpy as jnp
from jax.experimental import pallas as pl
from jax.experimental.pallas import tpu as pltpu


_GELU_C = math.sqrt(2.0 / math.pi)


def _round_up(v, m):
    return (v + m - 1) // m * m


def _mlp_kernel(x_ref, wfc_ref, bfc_ref, wproj_ref, bproj_ref, o_ref, acc_ref):
    # x_ref:     (tm, dmodel_p)
    # wfc_ref:   (dmodel_p, tk)
    # bfc_ref:   (1, tk)
    # wproj_ref: (tk, dmodel_p)
    # bproj_ref: (1, dmodel_p)
    # o_ref:     (tm, dmodel_p)
    # acc_ref:   (tm, dmodel_p) f32 scratch, persistent across the dff axis.
    j = pl.program_id(1)

    @pl.when(j == 0)
    def _():
        acc_ref[...] = jnp.zeros_like(acc_ref)

    # c_fc slab: (tm, tk), f32 accumulation on the MXU.
    h = jnp.dot(x_ref[...], wfc_ref[...], preferred_element_type=jnp.float32)
    h = h + bfc_ref[...].astype(jnp.float32)

    # NewGELU (factored): 0.5*h*(1 + tanh(c*h*(1 + 0.044715*h*h))); tanh -> EUP.
    h = 0.5 * h * (1.0 + jnp.tanh(_GELU_C * h * (1.0 + 0.044715 * (h * h))))

    # c_proj slab contribution, accumulated in f32.
    acc_ref[...] += jnp.dot(h.astype(wproj_ref.dtype), wproj_ref[...],
                            preferred_element_type=jnp.float32)

    @pl.when(j == pl.num_programs(1) - 1)
    def _():
        # TODO(synk): nn.Dropout is identity in eval mode; training-mode masking
        # (pltpu.prng_random_bits + 1/(1-p) scaling) is not applied here.
        o_ref[...] = (acc_ref[...] + bproj_ref[...].astype(jnp.float32)
                      ).astype(o_ref.dtype)


def mlp_forward(x, w_fc, b_fc, w_proj, b_proj, *, tm=None, tk=None,
                vmem_budget_bytes=44 * 1024 * 1024):
    """x: (B, T, dmodel) -> (B, T, dmodel).  W_fc: (dmodel, dff), W_proj: (dff, dmodel)."""
    B, T, dmodel = x.shape
    dff = w_fc.shape[1]
    assert w_fc.shape[0] == dmodel and w_proj.shape == (dff, dmodel)
    M = B * T

    in_bytes = jnp.dtype(x.dtype).itemsize
    w_bytes = jnp.dtype(w_fc.dtype).itemsize
    out_bytes = in_bytes

    # ---- tile selection -------------------------------------------------
    dmodel_p = _round_up(dmodel, 128)          # lane-dense output / MXU N dim
    dff_p = _round_up(dff, 128)

    if tm is None:
        tm = min(256, _round_up(M, 16))        # big row tile, 16-multiple (bf16-safe)
    tm = max(16, _round_up(tm, 16))

    if tk is None:
        tk = min(512, dff_p)                   # dff reduction slab
    tk = max(128, _round_up(tk, 128))
    while dff_p % tk != 0:
        tk -= 128

    def vmem_est(tm_, tk_):
        return (2 * tm_ * dmodel_p * in_bytes      # x tile (double-buffered)
                + 2 * dmodel_p * tk_ * w_bytes     # W_fc slab
                + 2 * tk_ * w_bytes                # b_fc slab
                + 2 * tk_ * dmodel_p * w_bytes     # W_proj slab
                + 2 * dmodel_p * w_bytes           # b_proj
                + 2 * tm_ * dmodel_p * out_bytes   # output tile
                + tm_ * dmodel_p * 4)              # f32 accumulator scratch

    # Shrink tiles until the working set fits the (v7x-safe) VMEM budget.
    while vmem_est(tm, tk) > vmem_budget_bytes and (tk > 128 or tm > 16):
        if tk > 128:
            tk = max(128, _round_up(tk // 2, 128))
            while dff_p % tk != 0:
                tk -= 128
        else:
            tm = max(16, _round_up(tm // 2, 16))

    M_p = _round_up(M, tm)

    # ---- zero-pad to tile boundaries (exact: padded slots contribute 0) --
    x2 = jnp.pad(x.reshape(M, dmodel), ((0, M_p - M), (0, dmodel_p - dmodel)))
    wfc_p = jnp.pad(w_fc, ((0, dmodel_p - dmodel), (0, dff_p - dff)))
    bfc_p = jnp.pad(b_fc.reshape(1, dff), ((0, 0), (0, dff_p - dff)))
    wproj_p = jnp.pad(w_proj, ((0, dff_p - dff), (0, dmodel_p - dmodel)))
    bproj_p = jnp.pad(b_proj.reshape(1, dmodel), ((0, 0), (0, dmodel_p - dmodel)))

    grid = (M_p // tm, dff_p // tk)            # rows parallel, dff = reduction (last)

    vmem_limit = int(min(64 * 1024 * 1024,
                         max(32 * 1024 * 1024, vmem_est(tm, tk) + (8 << 20))))

    cost = pl.CostEstimate(
        flops=4 * M * dmodel * dff,            # two matmuls
        transcendentals=M * dff,               # tanh in NewGELU
        bytes_accessed=(x2.size * in_bytes + wfc_p.size * w_bytes
                        + wproj_p.size * w_bytes + M_p * dmodel_p * out_bytes),
    )

    out2 = pl.pallas_call(
        _mlp_kernel,
        out_shape=jax.ShapeDtypeStruct((M_p, dmodel_p), x.dtype),
        grid_spec=pltpu.PrefetchScalarGridSpec(
            num_scalar_prefetch=0,
            grid=grid,
            in_specs=[
                pl.BlockSpec((tm, dmodel_p), lambda i, j: (i, 0)),   # x row tile
                pl.BlockSpec((dmodel_p, tk), lambda i, j: (0, j)),   # W_fc slab
                pl.BlockSpec((1, tk), lambda i, j: (0, j)),          # b_fc slab
                pl.BlockSpec((tk, dmodel_p), lambda i, j: (j, 0)),   # W_proj slab
                pl.BlockSpec((1, dmodel_p), lambda i, j: (0, 0)),    # b_proj
            ],
            out_specs=pl.BlockSpec((tm, dmodel_p), lambda i, j: (i, 0)),
            scratch_shapes=[pltpu.VMEM((tm, dmodel_p), jnp.float32)],
        ),
        compiler_params=pltpu.CompilerParams(
            dimension_semantics=("parallel", "arbitrary"),
            vmem_limit_bytes=vmem_limit,
        ),
        cost_estimate=cost,
    )(x2, wfc_p, bfc_p, wproj_p, bproj_p)

    return out2[:M, :dmodel].reshape(B, T, dmodel)


def mlp_reference(x, w_fc, b_fc, w_proj, b_proj):
    """Plain-JAX reference mirroring the PyTorch module (eval mode)."""
    h = jnp.dot(x, w_fc) + b_fc
    h = 0.5 * h * (1.0 + jnp.tanh(_GELU_C * (h + 0.044715 * h ** 3)))
    return jnp.dot(h, w_proj) + b_proj


if __name__ == "__main__":
    key = jax.random.PRNGKey(0)

    # ---- Case 1: small shapes consistent with the module (dmodel=32, dff=128).
    B, T, dmodel, dff = 2, 8, 32, 128
    k_x, k_wfc, k_wproj, key = jax.random.split(key, 4)
    x = jax.random.normal(k_x, (B, T, dmodel), dtype=jnp.float32)
    w_fc = 0.02 * jax.random.normal(k_wfc, (dmodel, dff), dtype=jnp.float32)
    b_fc = jnp.zeros((dff,), dtype=jnp.float32)
    w_proj = 0.02 * jax.random.normal(k_wproj, (dff, dmodel), dtype=jnp.float32)
    b_proj = jnp.zeros((dmodel,), dtype=jnp.float32)

    y = jax.block_until_ready(mlp_forward(x, w_fc, b_fc, w_proj, b_proj))
    y_ref = mlp_reference(x, w_fc, b_fc, w_proj, b_proj)
    assert y.shape == (B, T, dmodel)
    assert jnp.allclose(y, y_ref, atol=2e-5, rtol=1e-4), "mismatch vs reference (small)"

    # ---- Case 2: exercises multi-step grid (2 row tiles x 2 dff slabs) and the
    # f32 accumulator / pl.when init-finalize path.
    B2, T2, d2, f2 = 2, 256, 256, 1024
    k_x2, k_w1, k_w2, key = jax.random.split(key, 4)
    x2 = jax.random.normal(k_x2, (B2, T2, d2), dtype=jnp.float32)
    w1 = 0.02 * jax.random.normal(k_w1, (d2, f2), dtype=jnp.float32)
    bb1 = jnp.zeros((f2,), dtype=jnp.float32)
    w2 = 0.02 * jax.random.normal(k_w2, (f2, d2), dtype=jnp.float32)
    bb2 = jnp.zeros((d2,), dtype=jnp.float32)

    y2 = jax.block_until_ready(mlp_forward(x2, w1, bb1, w2, bb2))
    y2_ref = mlp_reference(x2, w1, bb1, w2, bb2)
    assert y2.shape == (B2, T2, d2)
    assert jnp.allclose(y2, y2_ref, atol=1e-3, rtol=1e-2), "mismatch vs reference (tiled)"

    print("KERNEL_OK")
</pallas_src>

<mosaic_0001>
module attributes {stable_mosaic.version = 11 : i64} {
  func.func @_mlp_kernel(%arg0: i32, %arg1: i32, %arg2: memref<16x128xf32, #tpu.memory_space<vmem>>, %arg3: memref<128x128xf32, #tpu.memory_space<vmem>>, %arg4: memref<1x128xf32, #tpu.memory_space<vmem>>, %arg5: memref<128x128xf32, #tpu.memory_space<vmem>>, %arg6: memref<1x128xf32, #tpu.memory_space<vmem>>, %arg7: memref<16x128xf32, #tpu.memory_space<vmem>>, %arg8: memref<16x128xf32, #tpu.memory_space<vmem>>) attributes {dimension_semantics = [#tpu.dimension_semantics<parallel>, #tpu.dimension_semantics<arbitrary>], iteration_bounds = array<i64: 1, 1>, scalar_prefetch = 0 : i64, scratch_operands = 1 : i64, tpu.core_type = #tpu.core_type<tc>, window_params = [{transform_indices = @transform_0, window_bounds = array<i64: 16, 128>}, {transform_indices = @transform_1, window_bounds = array<i64: 128, 128>}, {transform_indices = @transform_2, window_bounds = array<i64: 1, 128>}, {transform_indices = @transform_3, window_bounds = array<i64: 128, 128>}, {pipeline_mode = #tpu.pipeline_mode<synchronous>, transform_indices = @transform_4, window_bounds = array<i64: 1, 128>}, {transform_indices = @transform_5, window_bounds = array<i64: 16, 128>}]} {
    %c0_i32 = arith.constant 0 : i32
    %0 = arith.cmpi eq, %arg1, %c0_i32 : i32
    %1 = arith.extui %0 : i1 to i32
    %c0_i32_0 = arith.constant 0 : i32
    %2 = arith.cmpi ne, %1, %c0_i32_0 : i32
    scf.if %2 {
      %cst_20 = arith.constant 0.000000e+00 : f32
      %31 = vector.broadcast %cst_20 : f32 to vector<16x128xf32>
      %c0_21 = arith.constant 0 : index
      %c0_22 = arith.constant 0 : index
      %32 = vector.load %arg8[%c0_21, %c0_22] : memref<16x128xf32, #tpu.memory_space<vmem>>, vector<16x128xf32>
      tpu.vector_store %arg8[%c0_21, %c0_22], %31 {strides = array<i32>} : memref<16x128xf32, #tpu.memory_space<vmem>>, vector<16x128xf32>,
    } else {
    }
    %c0 = arith.constant 0 : index
    %c0_1 = arith.constant 0 : index
    %3 = vector.load %arg2[%c0, %c0_1] : memref<16x128xf32, #tpu.memory_space<vmem>>, vector<16x128xf32>
    %c0_2 = arith.constant 0 : index
    %c0_3 = arith.constant 0 : index
    %4 = vector.load %arg3[%c0_2, %c0_3] : memref<128x128xf32, #tpu.memory_space<vmem>>, vector<128x128xf32>
    %cst = arith.constant dense<0.000000e+00> : vector<16x128xf32>
    %5 = tpu.matmul %3, %4, %cst {dimension_numbers = #tpu.dot_dimension_numbers<[1], [0], [0], [1], [0, 0, 1, 1], [], []>} : vector<16x128xf32>, vector<128x128xf32>, vector<16x128xf32> -> vector<16x128xf32>
    %c0_4 = arith.constant 0 : index
    %c0_5 = arith.constant 0 : index
    %6 = vector.load %arg4[%c0_4, %c0_5] : memref<1x128xf32, #tpu.memory_space<vmem>>, vector<1x128xf32>
    %7 = vector.broadcast %6 : vector<1x128xf32> to vector<16x128xf32>
    %8 = arith.addf %5, %7 : vector<16x128xf32>
    %cst_6 = arith.constant 5.000000e-01 : f32
    %9 = vector.broadcast %cst_6 : f32 to vector<16x128xf32>
    %10 = arith.mulf %9, %8 : vector<16x128xf32>
    %cst_7 = arith.constant 0.797884583 : f32
    %11 = vector.broadcast %cst_7 : f32 to vector<16x128xf32>
    %12 = arith.mulf %11, %8 : vector<16x128xf32>
    %13 = arith.mulf %8, %8 : vector<16x128xf32>
    %cst_8 = arith.constant 4.471500e-02 : f32
    %14 = vector.broadcast %cst_8 : f32 to vector<16x128xf32>
    %15 = arith.mulf %14, %13 : vector<16x128xf32>
    %cst_9 = arith.constant 1.000000e+00 : f32
    %16 = vector.broadcast %cst_9 : f32 to vector<16x128xf32>
    %17 = arith.addf %16, %15 : vector<16x128xf32>
    %18 = arith.mulf %12, %17 : vector<16x128xf32>
    %19 = math.tanh %18 : vector<16x128xf32>
    %cst_10 = arith.constant 1.000000e+00 : f32
    %20 = vector.broadcast %cst_10 : f32 to vector<16x128xf32>
    %21 = arith.addf %20, %19 : vector<16x128xf32>
    %22 = arith.mulf %10, %21 : vector<16x128xf32>
    %c0_11 = arith.constant 0 : index
    %c0_12 = arith.constant 0 : index
    %23 = vector.load %arg8[%c0_11, %c0_12] : memref<16x128xf32, #tpu.memory_space<vmem>>, vector<16x128xf32>
    %c0_13 = arith.constant 0 : index
    %c0_14 = arith.constant 0 : index
    %24 = vector.load %arg5[%c0_13, %c0_14] : memref<128x128xf32, #tpu.memory_space<vmem>>, vector<128x128xf32>
    %cst_15 = arith.constant dense<0.000000e+00> : vector<16x128xf32>
    %25 = tpu.matmul %22, %24, %cst_15 {dimension_numbers = #tpu.dot_dimension_numbers<[1], [0], [0], [1], [0, 0, 1, 1], [], []>} : vector<16x128xf32>, vector<128x128xf32>, vector<16x128xf32> -> vector<16x128xf32>
    %26 = arith.addf %23, %25 : vector<16x128xf32>
    %c0_16 = arith.constant 0 : index
    %c0_17 = arith.constant 0 : index
    %27 = vector.load %arg8[%c0_16, %c0_17] : memref<16x128xf32, #tpu.memory_space<vmem>>, vector<16x128xf32>
    tpu.vector_store %arg8[%c0_16, %c0_17], %26 {strides = array<i32>} : memref<16x128xf32, #tpu.memory_space<vmem>>, vector<16x128xf32>,
    %c0_i32_18 = arith.constant 0 : i32
    %28 = arith.cmpi eq, %arg1, %c0_i32_18 : i32
    %29 = arith.extui %28 : i1 to i32
    %c0_i32_19 = arith.constant 0 : i32
    %30 = arith.cmpi ne, %29, %c0_i32_19 : i32
    scf.if %30 {
      %c0_20 = arith.constant 0 : index
      %c0_21 = arith.constant 0 : index
      %31 = vector.load %arg8[%c0_20, %c0_21] : memref<16x128xf32, #tpu.memory_space<vmem>>, vector<16x128xf32>
      %c0_22 = arith.constant 0 : index
      %c0_23 = arith.constant 0 : index
      %32 = vector.load %arg6[%c0_22, %c0_23] : memref<1x128xf32, #tpu.memory_space<vmem>>, vector<1x128xf32>
      %33 = vector.broadcast %32 : vector<1x128xf32> to vector<16x128xf32>
      %34 = arith.addf %31, %33 : vector<16x128xf32>
      %c0_24 = arith.constant 0 : index
      %c0_25 = arith.constant 0 : index
      %35 = vector.load %arg7[%c0_24, %c0_25] : memref<16x128xf32, #tpu.memory_space<vmem>>, vector<16x128xf32>
      tpu.vector_store %arg7[%c0_24, %c0_25], %34 {strides = array<i32>} : memref<16x128xf32, #tpu.memory_space<vmem>>, vector<16x128xf32>,
    } else {
    }
    return
  }
  func.func @transform_0(%arg0: i32, %arg1: i32) -> (i32, i32) {
    %c0_i32 = arith.constant 0 : i32
    %c0_i32_0 = arith.constant 0 : i32
    return %arg0, %c0_i32 : i32, i32
  }
  func.func @transform_1(%arg0: i32, %arg1: i32) -> (i32, i32) {
    %c0_i32 = arith.constant 0 : i32
    %c0_i32_0 = arith.constant 0 : i32
    return %c0_i32, %arg1 : i32, i32
  }
  func.func @transform_2(%arg0: i32, %arg1: i32) -> (i32, i32) {
    %c0_i32 = arith.constant 0 : i32
    %c0_i32_0 = arith.constant 0 : i32
    return %c0_i32, %arg1 : i32, i32
  }
  func.func @transform_3(%arg0: i32, %arg1: i32) -> (i32, i32) {
    %c0_i32 = arith.constant 0 : i32
    %c0_i32_0 = arith.constant 0 : i32
    return %arg1, %c0_i32 : i32, i32
  }
  func.func @transform_4(%arg0: i32, %arg1: i32) -> (i32, i32) {
    %c0_i32 = arith.constant 0 : i32
    %c0_i32_0 = arith.constant 0 : i32
    %c0_i32_1 = arith.constant 0 : i32
    return %c0_i32, %c0_i32_0 : i32, i32
  }
  func.func @transform_5(%arg0: i32, %arg1: i32) -> (i32, i32) {
    %c0_i32 = arith.constant 0 : i32
    %c0_i32_0 = arith.constant 0 : i32
    return %arg0, %c0_i32 : i32, i32
  }
}

</mosaic_0001>

<bundles_post_ra>
// kernel: tpu_custom_call.1
= control target key start
LH: loop header
LB: loop body
LE: loop exit
PB: predicated region body
PF: predicated region fallthrough
CT: control target
= control target key end

     0   :  { %10 = vsyncpa [#allocation4], 0  ;;  %s587_s0 = inlined_call_operand.hbm [shape: f32[16,128], index: 0, kind: input, shape index: {}]   ;;  %s588_s1 = inlined_call_operand.hbm [shape: f32[128,128], index: 1, kind: input, shape index: {}]   ;;  %s589_s2 = inlined_call_operand.vmem [shape: f32[1,128], index: 2, kind: input, shape index: {}]   ;;  %s590_s3 = inlined_call_operand.hbm [shape: f32[128,128], index: 3, kind: input, shape index: {}]   ;;  %s591_s4 = inlined_call_operand.vmem [shape: f32[1,128], index: 4, kind: input, shape index: {}]   ;;  %s592_s5 = inlined_call_operand.hbm [shape: f32[16,128], index: 5, kind: output, shape index: {}]  }
   0x1   :  { %11 = vsyncpa [#allocation7], 0 }
   0x2   :  { %12 = vsyncpa [#allocation5], 0  ;;  %s521_s18 = smov [#allocation6]   ;;  %s522_s20 = smov [#allocation3]  }
   0x3   :  { %s30_s19 = sshll.u32 %s521_s18, 4  ;;  %s18_s21 = sshll.u32 %s522_s20, 4  ;;  %s31_s19 = int_to_ptr.vmem [resolvable:$true] %s30_s19  ;;  %s19_s21 = int_to_ptr.vmem [resolvable:$true] %s18_s21 }
   0x4   :  { %s443_s22 = scalar_lea.vmem %s31_s19, 2048  ;;  %p448_p1 = scmp.lt.s32.totalorder %s31_s19, %s31_s19 }
   0x5   :  { %p444_p0 = scmp.ne.s32.totalorder %s31_s19, %s443_s22  ;;  %p449_p2 = scmp.lt.s32.totalorder %s443_s22, %s443_s22 }
   0x7   :  { %p450_p3 = por %p449_p2, %p448_p1 }
   0x9   :  { %p451_p4 = pnand %p450_p3, %p444_p0 }
   0xb   :  { %454 = shalt.err (!%p451_p4)
}
   0xc   :  { %s523_s23 = smov 128   ;;  %s524_s24 = smov 8  }
   0xd   :  { %36 = dma.hbm_to_vmem [thread:$0]  %s588_s1, 2048, %s31_s19, [#allocation7], %s523_s23, %s523_s23, %s524_s24  }
   0xe   :  { %s463_s27 = scalar_lea.vmem %s19_s21, 256  ;;  %p468_p6 = scmp.lt.s32.totalorder %s19_s21, %s19_s21 }
   0xf   :  { %p464_p5 = scmp.ne.s32.totalorder %s19_s21, %s463_s27  ;;  %p469_p7 = scmp.lt.s32.totalorder %s463_s27, %s463_s27 }
  0x11   :  { %p470_p8 = por %p469_p7, %p468_p6 }
  0x13   :  { %p471_p9 = pnand %p470_p8, %p464_p5 }
  0x15   :  { %474 = shalt.err (!%p471_p9)
}
  0x16   :  { %24 = dma.hbm_to_vmem [thread:$0]  %s587_s0, 256, %s19_s21, [#allocation4], %s523_s23, %s523_s23, %s524_s24  }
  0x17   :  { %s525_s30 = smov [#allocation8]  }
  0x18   :  { %s44_s6 = sshll.u32 %s525_s30, 4  ;;  %s45_s6 = int_to_ptr.vmem [resolvable:$true] %s44_s6 }
  0x19   :  { %s483_s7 = scalar_lea.vmem %s45_s6, 2048  ;;  %p488_p11 = scmp.lt.s32.totalorder %s45_s6, %s45_s6 }
  0x1a   :  { %p484_p10 = scmp.ne.s32.totalorder %s45_s6, %s483_s7  ;;  %p489_p12 = scmp.lt.s32.totalorder %s483_s7, %s483_s7 }
  0x1c   :  { %p490_p13 = por %p489_p12, %p488_p11 }
  0x1e   :  { %p491_p0 = pnand %p490_p13, %p484_p10 }
  0x20   :  { %494 = shalt.err (!%p491_p0)
}
  0x21   :  { %50 = dma.hbm_to_vmem [thread:$0]  %s590_s3, 2048, %s45_s6, [#allocation7], %s523_s23, %s523_s23, %s524_s24  }
  0x22   :  { %515 = dma.done.wait [#allocation4], 256  }
  0x23   :  { %516 = vsyncadd [#allocation4], 4294967040 }
  0x24   :  { %517 = dma.done.wait [#allocation7], 4096  }
  0x25   :  { %518 = vsyncadd [#allocation7], 4294963200  ;;  %v85_v0 = vld [vmem:[#allocation6 + $0x78] sm:$0xff]  ;;  %v84_v1 = vld [vmem:[#allocation6 + $0x70] sm:$0xff]  ;;  %s526_s10 = smov [#allocation9]  }
  0x26   :  { %355 = vmatprep.subr.mxu0 %v85_v0  ;;  %v83_v2 = vld [vmem:[#allocation6 + $0x68] sm:$0xff]  ;;  %v82_v3 = vld [vmem:[#allocation6 + $0x60] sm:$0xff]  ;;  %v68_v4 = vld [vmem:[#allocation3] sm:$0xff]  ;;  %s304_s11 = sshll.u32 %s526_s10, 4  ;;  %s305_s11 = int_to_ptr.vmem [resolvable:$true] %s304_s11 }
  0x27   :  { %356 = vmatpush3.msra.mxu0 %v85_v0  ;;  %v81_v5 = vld [vmem:[#allocation6 + $0x58] sm:$0xff]  ;;  %387 = vmatprep.mubr.f32.mxu0 %v68_v4  ;;  %v80_v6 = vld [vmem:[#allocation6 + $0x50] sm:$0xff]  ;;  %v79_v7 = vld [vmem:[#allocation6 + $0x48] sm:$0xff]  ;;  %s495_s12 = scalar_lea.vmem %s305_s11, 256  ;;  %p500_p2 = scmp.lt.s32.totalorder %s305_s11, %s305_s11 }
  0x28   :  { %357 = vmatprep.subr.mxu0 %v84_v1  ;;  %v78_v8 = vld [vmem:[#allocation6 + $0x40] sm:$0xff]  ;;  %v77_v9 = vld [vmem:[#allocation6 + $0x38] sm:$0xff]  ;;  %v76_v10 = vld [vmem:[#allocation6 + $0x30] sm:$0xff]  ;;  %p496_p1 = scmp.ne.s32.totalorder %s305_s11, %s495_s12  ;;  %p501_p3 = scmp.lt.s32.totalorder %s495_s12, %s495_s12 }
  0x29   :  { %358 = vmatpush3.msra.mxu0 %v84_v1  ;;  %v75_v11 = vld [vmem:[#allocation6 + $0x28] sm:$0xff]  ;;  %v74_v12 = vld [vmem:[#allocation6 + $0x20] sm:$0xff]  ;;  %v73_v13 = vld [vmem:[#allocation6 + $0x18] sm:$0xff] }
  0x2a   :  { %359 = vmatprep.subr.mxu0 %v83_v2  ;;  %v72_v14 = vld [vmem:[#allocation6 + $0x10] sm:$0xff]  ;;  %v71_v15 = vld [vmem:[#allocation6 + $0x8] sm:$0xff]  ;;  %v70_v16 = vld [vmem:[#allocation6] sm:$0xff]  ;;  %p502_p4 = por %p501_p3, %p500_p2 }
  0x2b   :  { %360 = vmatpush3.msra.mxu0 %v83_v2  ;;  %v69_v17 = vld [vmem:[#allocation3 + $0x8] sm:$0xff]  ;;  %v202_v19 = vld [vmem:[#allocation8 + $0x70] sm:$0xff]  ;;  %v201_v20 = vld [vmem:[#allocation8 + $0x68] sm:$0xff] }
  0x2c   :  { %361 = vmatprep.subr.mxu0 %v82_v3  ;;  %v203_v18 = vld [vmem:[#allocation8 + $0x78] sm:$0xff]  ;;  %v200_v21 = vld [vmem:[#allocation8 + $0x60] sm:$0xff]  ;;  %v198_v23 = vld [vmem:[#allocation8 + $0x50] sm:$0xff]  ;;  %p503_p5 = pnand %p502_p4, %p496_p1 }
  0x2d   :  { %362 = vmatpush3.msra.mxu0 %v82_v3  ;;  %390 = vmatprep.subr.mxu1 %v203_v18  ;;  %v199_v22 = vld [vmem:[#allocation8 + $0x58] sm:$0xff]  ;;  %v197_v24 = vld [vmem:[#allocation8 + $0x48] sm:$0xff]  ;;  %v196_v25 = vld [vmem:[#allocation8 + $0x40] sm:$0xff] }
  0x2e   :  { %363 = vmatprep.subr.mxu0 %v81_v5  ;;  %391 = vmatpush3.msra.mxu1 %v203_v18  ;;  %v195_v26 = vld [vmem:[#allocation8 + $0x38] sm:$0xff]  ;;  %v194_v27 = vld [vmem:[#allocation8 + $0x30] sm:$0xff]  ;;  %v193_v28 = vld [vmem:[#allocation8 + $0x28] sm:$0xff] }
  0x2f   :  { %364 = vmatpush3.msra.mxu0 %v81_v5  ;;  %392 = vmatprep.subr.mxu1 %v202_v19  ;;  %v192_v29 = vld [vmem:[#allocation8 + $0x20] sm:$0xff]  ;;  %v191_v30 = vld [vmem:[#allocation8 + $0x18] sm:$0xff]  ;;  %v190_v31 = vld [vmem:[#allocation8 + $0x10] sm:$0xff] }
  0x30   :  { %365 = vmatprep.subr.mxu0 %v80_v6  ;;  %393 = vmatpush3.msra.mxu1 %v202_v19  ;;  %v189_v32 = vld [vmem:[#allocation8 + $0x8] sm:$0xff]  ;;  %v188_v33 = vld [vmem:[#allocation8] sm:$0xff]  ;;  %v317_v34 = vld [vmem:[%s589_s2] ss:$0 sm:$0xff] }
  0x31   :  { %366 = vmatpush3.msra.mxu0 %v80_v6  ;;  %394 = vmatprep.subr.mxu1 %v201_v20  ;;  %v318_v57 = vld [vmem:[%s591_s4] ss:$0 sm:$0xff] }
  0x32   :  { %367 = vmatprep.subr.mxu0 %v79_v7  ;;  %395 = vmatpush3.msra.mxu1 %v201_v20 }
  0x33   :  { %368 = vmatpush3.msra.mxu0 %v79_v7  ;;  %396 = vmatprep.subr.mxu1 %v200_v21 }
  0x34   :  { %369 = vmatprep.subr.mxu0 %v78_v8  ;;  %397 = vmatpush3.msra.mxu1 %v200_v21 }
  0x35   :  { %370 = vmatpush3.msra.mxu0 %v78_v8  ;;  %398 = vmatprep.subr.mxu1 %v199_v22 }
  0x36   :  { %371 = vmatprep.subr.mxu0 %v77_v9  ;;  %399 = vmatpush3.msra.mxu1 %v199_v22 }
  0x37   :  { %372 = vmatpush3.msra.mxu0 %v77_v9  ;;  %400 = vmatprep.subr.mxu1 %v198_v23 }
  0x38   :  { %373 = vmatprep.subr.mxu0 %v76_v10  ;;  %401 = vmatpush3.msra.mxu1 %v198_v23 }
  0x39   :  { %374 = vmatpush3.msra.mxu0 %v76_v10  ;;  %402 = vmatprep.subr.mxu1 %v197_v24 }
  0x3a   :  { %375 = vmatprep.subr.mxu0 %v75_v11  ;;  %403 = vmatpush3.msra.mxu1 %v197_v24 }
  0x3b   :  { %376 = vmatpush3.msra.mxu0 %v75_v11  ;;  %404 = vmatprep.subr.mxu1 %v196_v25 }
  0x3c   :  { %377 = vmatprep.subr.mxu0 %v74_v12  ;;  %405 = vmatpush3.msra.mxu1 %v196_v25 }
  0x3d   :  { %378 = vmatpush3.msra.mxu0 %v74_v12  ;;  %406 = vmatprep.subr.mxu1 %v195_v26 }
  0x3e   :  { %379 = vmatprep.subr.mxu0 %v73_v13  ;;  %407 = vmatpush3.msra.mxu1 %v195_v26 }
  0x3f   :  { %380 = vmatpush3.msra.mxu0 %v73_v13  ;;  %408 = vmatprep.subr.mxu1 %v194_v27 }
  0x40   :  { %381 = vmatprep.subr.mxu0 %v72_v14  ;;  %409 = vmatpush3.msra.mxu1 %v194_v27 }
  0x41   :  { %382 = vmatpush3.msra.mxu0 %v72_v14  ;;  %410 = vmatprep.subr.mxu1 %v193_v28 }
  0x42   :  { %383 = vmatprep.subr.mxu0 %v71_v15  ;;  %411 = vmatpush3.msra.mxu1 %v193_v28 }
  0x43   :  { %384 = vmatpush3.msra.mxu0 %v71_v15  ;;  %412 = vmatprep.subr.mxu1 %v192_v29 }
  0x44   :  { %385 = vmatprep.subr.mxu0 %v70_v16  ;;  %413 = vmatpush3.msra.mxu1 %v192_v29 }
  0x45   :  { %386 = vmatpush3.msra.mxu0 %v70_v16  ;;  %414 = vmatprep.subr.mxu1 %v191_v30 }
  0x46   :  { %388 = vmatmul.mubr.f32.vlgmr.msra.gmra.mxu0 %v69_v17  ;;  %415 = vmatpush3.msra.mxu1 %v191_v30 }
  0x47   :  { %416 = vmatprep.subr.mxu1 %v190_v31 }
  0x48   :  { %417 = vmatpush3.msra.mxu1 %v190_v31 }
  0x49   :  { %418 = vmatprep.subr.mxu1 %v189_v32 }
  0x4a   :  { %419 = vmatpush3.msra.mxu1 %v189_v32 }
  0x4b   :  { %420 = vmatprep.subr.mxu1 %v188_v33 }
  0x4c   :  { %421 = vmatpush3.msra.mxu1 %v188_v33 }
 0x106   :  { %v389_v35 = vpop.f32.mrf.mxu0 }
 0x107   :  { %v165_v36 = vadd.f32 %v389_v35, %v317_v34 }
 0x108   :  { %v159_v37 = vpop.f32.mrf.mxu0 }
 0x109   :  { %v173_v38 = vmul.f32 %v165_v36, %v165_v36  ;;  %v160_v39 = vadd.f32 %v317_v34, %v159_v37  ;;  %v171_v42 = vmul.f32 0.7978846, %v165_v36  ;;  %v169_v54 = vmul.f32 0.5, %v165_v36 }
 0x10b   :  { %v175_v40 = vmul.f32 0.044715, %v173_v38  ;;  %v172_v41 = vmul.f32 %v160_v39, %v160_v39  ;;  %v170_v46 = vmul.f32 0.7978846, %v160_v39  ;;  %v168_v52 = vmul.f32 0.5, %v160_v39 }
 0x10d   :  { %v177_v43 = vadd.f32 1.0, %v175_v40  ;;  %v174_v44 = vmul.f32 0.044715, %v172_v41 }
 0x10f   :  { %v179_v45 = vmul.f32 %v177_v43, %v171_v42  ;;  %v176_v47 = vadd.f32 1.0, %v174_v44 }
 0x111   :  { %431 = vtanh.f32 %v179_v45  ;;  %v178_v48 = vmul.f32 %v176_v47, %v170_v46 }
 0x113   :  { %433 = vtanh.f32 %v178_v48 }
 0x11e   :  { %v432_v49 = vpop.eup %431 }
 0x11f   :  { %v183_v51 = vadd.f32 1.0, %v432_v49 }
 0x120   :  { %v434_v50 = vpop.eup %433 }
 0x121   :  { %v182_v53 = vadd.f32 1.0, %v434_v50  ;;  %v185_v56 = vmul.f32 %v183_v51, %v169_v54 }
 0x123   :  { %v184_v55 = vmul.f32 %v182_v53, %v168_v52 }
 0x125   :  { %422 = vmatprep.mubr.f32.mxu1 %v184_v55 }
 0x126   :  { %423 = vmatmul.mubr.f32.vlgmr.msra.gmra.mxu1 %v185_v56 }
 0x1e6   :  { %v424_v58 = vpop.f32.mrf.mxu1 }
 0x1e7   :  { %v296_v59 = vadd.f32 %v424_v58, %v318_v57 }
 0x1e8   :  { %v270_v60 = vpop.f32.mrf.mxu1 }
 0x1e9   :  { %298 = vst [vmem:[#allocation9 + $0x8] sm:$0xff] %v296_v59  ;;  %v295_v61 = vadd.f32 %v318_v57, %v270_v60 }
 0x1eb   :  { %297 = vst [vmem:[#allocation9] sm:$0xff] %v295_v61 }
 0x1ec   :  { %506 = shalt.err (!%p503_p5)
}
 0x1ed   :  { %310 = dma.vmem_to_hbm [thread:$0]  %s305_s11, 256, %s592_s5, [#allocation5], %s523_s23, %s523_s23, %s524_s24  }
 0x1ee   :  { %519 = dma.done.wait [#allocation5], 256  }
 0x1ef   :  { %520 = vsyncadd [#allocation5], 4294967040 }
 0x1f0   :  { %314 = vsyncpa [#allocation4], 1 }
 0x1f1   :  { %315 = vsyncpa [#allocation7], 1 }
 0x1f2   :  { %316 = vsyncpa [#allocation5], 1 }

</bundles_post_ra>
